<compile_context>
chip_gen: v6e
topology: v6e:2x2x1
jax: 0.10.0
libtpu: 0.0.40
codegen_flags: <defaults>
</compile_context>

<pallas_src>
import jax
import jax.numpy as jnp
from jax.experimental import pallas as pl
from jax.experimental.pallas import tpu as pltpu


# ----------------------------- Pallas kernel ------------------------------ #

def _causal_stack(x, K, dilation):
    """(C, L) -> (K*C, L): row-block j is x shifted right by (K-1-j)*dilation,
    zero-filled on the left.  This *is* Conv1d's left padding + Chomp1d."""
    C, L = x.shape
    pad = (K - 1) * dilation
    if pad == 0:
        return x
    xp = jnp.concatenate([jnp.zeros((C, pad), x.dtype), x], axis=1)   # (C, L+pad)
    return jnp.concatenate(
        [xp[:, j * dilation:j * dilation + L] for j in range(K)], axis=0)


def _make_block_kernel(K, dilation, has_down):
    """Fused TemporalBlock kernel (one batch element per grid step).

    x_ref  : (1, Cin,  L)    input (NCW slice)
    w1_ref : (Cout, K*Cin)   conv1 taps stacked along the contraction axis
    b1_ref : (Cout, 1)
    w2_ref : (Cout, K*Cout)  conv2 taps stacked along the contraction axis
    b2_ref : (Cout, 1)
    dw_ref : (Cout, Cin)     (only if has_down) 1x1 downsample weight
    db_ref : (Cout, 1)       (only if has_down) 1x1 downsample bias
    o_ref  : (1, Cout, L)
    """
    def kernel(x_ref, w1_ref, b1_ref, w2_ref, b2_ref, *rest):
        if has_down:
            dw_ref, db_ref, o_ref = rest
        else:
            (o_ref,) = rest

        x = x_ref[0]                                             # (Cin, L)

        # conv1 (causal, dilated) + bias + relu; single MXU dot over K*Cin.
        h1 = jnp.dot(w1_ref[...], _causal_stack(x, K, dilation),
                     preferred_element_type=jnp.float32)         # (Cout, L) f32
        h1 = jnp.maximum(h1 + b1_ref[...], 0.0)
        # TODO(synk): nn.Dropout(p=0.2) is the identity here (inference).

        # conv2 (causal, dilated) + bias + relu; h1 stays in VMEM/vregs.
        h2 = jnp.dot(w2_ref[...],
                     _causal_stack(h1.astype(x.dtype), K, dilation),
                     preferred_element_type=jnp.float32)         # (Cout, L) f32
        h2 = jnp.maximum(h2 + b2_ref[...], 0.0)

        # residual branch (identity or fused 1x1 conv) + final relu.
        if has_down:
            res = jnp.dot(dw_ref[...], x,
                          preferred_element_type=jnp.float32) + db_ref[...]
        else:
            res = x.astype(jnp.float32)
        o_ref[0] = jnp.maximum(h2 + res, 0.0).astype(o_ref.dtype)

    return kernel


def temporal_block(x, p, dilation):
    """Fused TemporalBlock forward.  x: (N, Cin, L) -> (N, Cout, L)."""
    N, Cin, L = x.shape
    K = p["kernel_size"]
    Cout = p["b1"].shape[0]
    has_down = p["down_w"] is not None

    in_specs = [
        pl.BlockSpec((1, Cin, L), lambda n: (n, 0, 0)),
        pl.BlockSpec((Cout, K * Cin), lambda n: (0, 0)),
        pl.BlockSpec((Cout, 1), lambda n: (0, 0)),
        pl.BlockSpec((Cout, K * Cout), lambda n: (0, 0)),
        pl.BlockSpec((Cout, 1), lambda n: (0, 0)),
    ]
    args = [x, p["w1"], p["b1"], p["w2"], p["b2"]]
    if has_down:
        in_specs += [pl.BlockSpec((Cout, Cin), lambda n: (0, 0)),
                     pl.BlockSpec((Cout, 1), lambda n: (0, 0))]
        args += [p["down_w"], p["down_b"]]

    # TODO(synk): for long sequences add an L-tile grid axis with a
    #             2*(K-1)*dilation halo and per-generation VMEM budgets
    #             (vmem_limit_bytes); here block == full L, so VMEM use is
    #             tiny and one grid step per batch element suffices.
    return pl.pallas_call(
        _make_block_kernel(K, dilation, has_down),
        out_shape=jax.ShapeDtypeStruct((N, Cout, L), x.dtype),
        grid=(N,),
        in_specs=in_specs,
        out_specs=pl.BlockSpec((1, Cout, L), lambda n: (n, 0, 0)),
        compiler_params=pltpu.CompilerParams(
            dimension_semantics=("parallel",)),
    )(*args)


# --------------------------- parameters (glue) ----------------------------- #

def _weight_norm_init(key, cout, cin, K):
    # .normal_(0, 0.01) on v; weight_norm effective weight is g*v/||v|| with
    # g initialized to ||v|| (so effectively == v).  Stored stacked as
    # (Cout, K*Cin) with block j == w[:, :, j].
    v = 0.01 * jax.random.normal(key, (cout, cin, K), jnp.float32)
    norm = jnp.sqrt(jnp.sum(v * v, axis=(1, 2), keepdims=True))
    w = norm * v / norm
    return jnp.transpose(w, (0, 2, 1)).reshape(cout, K * cin)


def init_tcn_params(key, num_inputs, num_channels, kernel_size):
    params = []
    for i, out_ch in enumerate(num_channels):
        in_ch = num_inputs if i == 0 else num_channels[i - 1]
        key, k1, k2, k3, k4, k5, k6 = jax.random.split(key, 7)
        p = {
            "kernel_size": kernel_size,
            "w1": _weight_norm_init(k1, out_ch, in_ch, kernel_size),
            "b1": 0.01 * jax.random.normal(k2, (out_ch, 1), jnp.float32),
            "w2": _weight_norm_init(k3, out_ch, out_ch, kernel_size),
            "b2": 0.01 * jax.random.normal(k4, (out_ch, 1), jnp.float32),
        }
        if in_ch != out_ch:
            p["down_w"] = 0.01 * jax.random.normal(k5, (out_ch, in_ch), jnp.float32)
            p["down_b"] = 0.01 * jax.random.normal(k6, (out_ch, 1), jnp.float32)
        else:
            p["down_w"] = None
            p["down_b"] = None
        params.append(p)
    return params


def _cast_block_params(p, dtype):
    q = dict(p)
    for k in ("w1", "w2", "down_w"):
        if q[k] is not None:
            q[k] = q[k].astype(dtype)
    return q


# ------------------------------- forward ----------------------------------- #

def temporal_conv_net(x_ncl, params, *, dtype=None):
    """x_ncl: (N, C_in, L) like the PyTorch module; returns (N, C_out, L).

    dtype: optional storage dtype for activations & conv weights (e.g.
    jnp.bfloat16).  Biases and all accumulation stay float32.
    """
    # TODO(synk): PyTorch casts the block to float64 in forward; TPU Pallas has
    #             no f64, so this runs in f32 (or bf16 storage + f32 accum).
    h = x_ncl if dtype is None else x_ncl.astype(dtype)
    for i, p in enumerate(params):
        if dtype is not None:
            p = _cast_block_params(p, dtype)
        h = temporal_block(h, p, dilation=2 ** i)
    return h


# --------------------------- pure-JAX reference ----------------------------- #

def _ref_causal_conv(x, w_st, b, K, dilation):
    # x: (N, C, L) f32; w_st: (Cout, K*C); returns (N, Cout, L).
    N, C, L = x.shape
    out = jnp.zeros((N, w_st.shape[0], L), jnp.float32)
    for j in range(K):
        s = (K - 1 - j) * dilation
        xs = jnp.pad(x, ((0, 0), (0, 0), (s, 0)))[:, :, :L]
        out = out + jnp.einsum("oc,ncl->nol", w_st[:, j * C:(j + 1) * C], xs)
    return out + b[None]


def ref_tcn(x_ncl, params):
    h = x_ncl.astype(jnp.float32)
    for i, p in enumerate(params):
        d, K = 2 ** i, p["kernel_size"]
        if p["down_w"] is None:
            res = h
        else:
            res = jnp.einsum("oc,ncl->nol", p["down_w"], h) + p["down_b"][None]
        h1 = jnp.maximum(_ref_causal_conv(h, p["w1"], p["b1"], K, d), 0.0)
        h2 = jnp.maximum(_ref_causal_conv(h1, p["w2"], p["b2"], K, d), 0.0)
        h = jnp.maximum(h2 + res, 0.0)
    return h


# --------------------------------- main ------------------------------------ #

if __name__ == "__main__":
    key = jax.random.PRNGKey(0)
    kx, kp = jax.random.split(key)

    N, C_in, L = 2, 4, 16
    num_channels = [8, 8]          # two TemporalBlocks: dilation 1, then 2
    kernel_size = 2

    x = jax.random.normal(kx, (N, C_in, L), jnp.float32)
    params = init_tcn_params(kp, C_in, num_channels, kernel_size)

    ref = ref_tcn(x, params)

    # f32 path (tight check against the pure-JAX reference).
    out = jax.block_until_ready(temporal_conv_net(x, params))
    assert out.shape == (N, num_channels[-1], L), out.shape
    assert jnp.allclose(out, ref, atol=1e-4), float(jnp.max(jnp.abs(out - ref)))

    # bf16 storage / f32 accumulation path (loose check).
    out_bf16 = jax.block_until_ready(
        temporal_conv_net(x, params, dtype=jnp.bfloat16)).astype(jnp.float32)
    assert jnp.allclose(out_bf16, ref, atol=2e-2), \
        float(jnp.max(jnp.abs(out_bf16 - ref)))

    print("KERNEL_OK")
</pallas_src>

<mosaic_0001>
module attributes {stable_mosaic.version = 11 : i64} {
  func.func @kernel(%arg0: i32, %arg1: memref<1x4x16xf32, #tpu.memory_space<vmem>>, %arg2: memref<8x8xf32, #tpu.memory_space<vmem>>, %arg3: memref<8x1xf32, #tpu.memory_space<vmem>>, %arg4: memref<8x16xf32, #tpu.memory_space<vmem>>, %arg5: memref<8x1xf32, #tpu.memory_space<vmem>>, %arg6: memref<8x4xf32, #tpu.memory_space<vmem>>, %arg7: memref<8x1xf32, #tpu.memory_space<vmem>>, %arg8: memref<1x8x16xf32, #tpu.memory_space<vmem>>) attributes {dimension_semantics = [#tpu.dimension_semantics<parallel>], iteration_bounds = array<i64: 2>, scalar_prefetch = 0 : i64, scratch_operands = 0 : i64, tpu.core_type = #tpu.core_type<tc>, window_params = [{transform_indices = @transform_0, window_bounds = array<i64: 1, 4, 16>}, {pipeline_mode = #tpu.pipeline_mode<synchronous>, transform_indices = @transform_1, window_bounds = array<i64: 8, 8>}, {pipeline_mode = #tpu.pipeline_mode<synchronous>, transform_indices = @transform_2, window_bounds = array<i64: 8, 1>}, {pipeline_mode = #tpu.pipeline_mode<synchronous>, transform_indices = @transform_3, window_bounds = array<i64: 8, 16>}, {pipeline_mode = #tpu.pipeline_mode<synchronous>, transform_indices = @transform_4, window_bounds = array<i64: 8, 1>}, {pipeline_mode = #tpu.pipeline_mode<synchronous>, transform_indices = @transform_5, window_bounds = array<i64: 8, 4>}, {pipeline_mode = #tpu.pipeline_mode<synchronous>, transform_indices = @transform_6, window_bounds = array<i64: 8, 1>}, {transform_indices = @transform_7, window_bounds = array<i64: 1, 8, 16>}]} {
    %c0 = arith.constant 0 : index
    %c0_0 = arith.constant 0 : index
    %c0_1 = arith.constant 0 : index
    %0 = vector.load %arg1[%c0, %c0_0, %c0_1] : memref<1x4x16xf32, #tpu.memory_space<vmem>>, vector<1x4x16xf32>
    %1 = vector.shape_cast %0 : vector<1x4x16xf32> to vector<4x16xf32>
    %c0_2 = arith.constant 0 : index
    %c0_3 = arith.constant 0 : index
    %2 = vector.load %arg2[%c0_2, %c0_3] : memref<8x8xf32, #tpu.memory_space<vmem>>, vector<8x8xf32>
    %cst = arith.constant 0.000000e+00 : f32
    %3 = vector.broadcast %cst : f32 to vector<4x1xf32>
    %4 = tpu.concatenate %3, %1 in 1 : vector<4x1xf32>, vector<4x16xf32> -> vector<4x17xf32>
    %5 = vector.extract_strided_slice %4 {offsets = [0, 0], sizes = [4, 16], strides = [1, 1]} : vector<4x17xf32> to vector<4x16xf32>
    %6 = vector.extract_strided_slice %4 {offsets = [0, 1], sizes = [4, 16], strides = [1, 1]} : vector<4x17xf32> to vector<4x16xf32>
    %7 = tpu.concatenate %5, %6 in 0 : vector<4x16xf32>, vector<4x16xf32> -> vector<8x16xf32>
    %cst_4 = arith.constant dense<0.000000e+00> : vector<8x16xf32>
    %8 = tpu.matmul %2, %7, %cst_4 {dimension_numbers = #tpu.dot_dimension_numbers<[1], [0], [0], [1], [0, 0, 1, 1], [], []>} : vector<8x8xf32>, vector<8x16xf32>, vector<8x16xf32> -> vector<8x16xf32>
    %c0_5 = arith.constant 0 : index
    %c0_6 = arith.constant 0 : index
    %9 = vector.load %arg3[%c0_5, %c0_6] : memref<8x1xf32, #tpu.memory_space<vmem>>, vector<8x1xf32>
    %10 = vector.broadcast %9 : vector<8x1xf32> to vector<8x16xf32>
    %11 = arith.addf %8, %10 : vector<8x16xf32>
    %cst_7 = arith.constant 0.000000e+00 : f32
    %12 = vector.broadcast %cst_7 : f32 to vector<8x16xf32>
    %13 = arith.maximumf %11, %12 : vector<8x16xf32>
    %c0_8 = arith.constant 0 : index
    %c0_9 = arith.constant 0 : index
    %14 = vector.load %arg4[%c0_8, %c0_9] : memref<8x16xf32, #tpu.memory_space<vmem>>, vector<8x16xf32>
    %cst_10 = arith.constant 0.000000e+00 : f32
    %15 = vector.broadcast %cst_10 : f32 to vector<8x1xf32>
    %16 = tpu.concatenate %15, %13 in 1 : vector<8x1xf32>, vector<8x16xf32> -> vector<8x17xf32>
    %17 = vector.extract_strided_slice %16 {offsets = [0, 0], sizes = [8, 16], strides = [1, 1]} : vector<8x17xf32> to vector<8x16xf32>
    %18 = vector.extract_strided_slice %16 {offsets = [0, 1], sizes = [8, 16], strides = [1, 1]} : vector<8x17xf32> to vector<8x16xf32>
    %19 = tpu.concatenate %17, %18 in 0 : vector<8x16xf32>, vector<8x16xf32> -> vector<16x16xf32>
    %cst_11 = arith.constant dense<0.000000e+00> : vector<8x16xf32>
    %20 = tpu.matmul %14, %19, %cst_11 {dimension_numbers = #tpu.dot_dimension_numbers<[1], [0], [0], [1], [0, 0, 1, 1], [], []>} : vector<8x16xf32>, vector<16x16xf32>, vector<8x16xf32> -> vector<8x16xf32>
    %c0_12 = arith.constant 0 : index
    %c0_13 = arith.constant 0 : index
    %21 = vector.load %arg5[%c0_12, %c0_13] : memref<8x1xf32, #tpu.memory_space<vmem>>, vector<8x1xf32>
    %22 = vector.broadcast %21 : vector<8x1xf32> to vector<8x16xf32>
    %23 = arith.addf %20, %22 : vector<8x16xf32>
    %cst_14 = arith.constant 0.000000e+00 : f32
    %24 = vector.broadcast %cst_14 : f32 to vector<8x16xf32>
    %25 = arith.maximumf %23, %24 : vector<8x16xf32>
    %c0_15 = arith.constant 0 : index
    %c0_16 = arith.constant 0 : index
    %26 = vector.load %arg6[%c0_15, %c0_16] : memref<8x4xf32, #tpu.memory_space<vmem>>, vector<8x4xf32>
    %cst_17 = arith.constant dense<0.000000e+00> : vector<8x16xf32>
    %27 = tpu.matmul %26, %1, %cst_17 {dimension_numbers = #tpu.dot_dimension_numbers<[1], [0], [0], [1], [0, 0, 1, 1], [], []>} : vector<8x4xf32>, vector<4x16xf32>, vector<8x16xf32> -> vector<8x16xf32>
    %c0_18 = arith.constant 0 : index
    %c0_19 = arith.constant 0 : index
    %28 = vector.load %arg7[%c0_18, %c0_19] : memref<8x1xf32, #tpu.memory_space<vmem>>, vector<8x1xf32>
    %29 = vector.broadcast %28 : vector<8x1xf32> to vector<8x16xf32>
    %30 = arith.addf %27, %29 : vector<8x16xf32>
    %31 = arith.addf %25, %30 : vector<8x16xf32>
    %cst_20 = arith.constant 0.000000e+00 : f32
    %32 = vector.broadcast %cst_20 : f32 to vector<8x16xf32>
    %33 = arith.maximumf %31, %32 : vector<8x16xf32>
    %c0_21 = arith.constant 0 : index
    %c0_22 = arith.constant 0 : index
    %c0_23 = arith.constant 0 : index
    %34 = vector.load %arg8[%c0_21, %c0_22, %c0_23] : memref<1x8x16xf32, #tpu.memory_space<vmem>>, vector<1x8x16xf32>
    %35 = vector.shape_cast %34 : vector<1x8x16xf32> to vector<8x16xf32>
    %36 = vector.shape_cast %33 : vector<8x16xf32> to vector<1x8x16xf32>
    tpu.vector_store %arg8[%c0_21, %c0_22, %c0_23], %36 {strides = array<i32>} : memref<1x8x16xf32, #tpu.memory_space<vmem>>, vector<1x8x16xf32>,
    return
  }
  func.func @transform_0(%arg0: i32) -> (i32, i32, i32) {
    %c0_i32 = arith.constant 0 : i32
    %c0_i32_0 = arith.constant 0 : i32
    %c0_i32_1 = arith.constant 0 : i32
    return %arg0, %c0_i32, %c0_i32_0 : i32, i32, i32
  }
  func.func @transform_1(%arg0: i32) -> (i32, i32) {
    %c0_i32 = arith.constant 0 : i32
    %c0_i32_0 = arith.constant 0 : i32
    %c0_i32_1 = arith.constant 0 : i32
    return %c0_i32, %c0_i32_0 : i32, i32
  }
  func.func @transform_2(%arg0: i32) -> (i32, i32) {
    %c0_i32 = arith.constant 0 : i32
    %c0_i32_0 = arith.constant 0 : i32
    %c0_i32_1 = arith.constant 0 : i32
    return %c0_i32, %c0_i32_0 : i32, i32
  }
  func.func @transform_3(%arg0: i32) -> (i32, i32) {
    %c0_i32 = arith.constant 0 : i32
    %c0_i32_0 = arith.constant 0 : i32
    %c0_i32_1 = arith.constant 0 : i32
    return %c0_i32, %c0_i32_0 : i32, i32
  }
  func.func @transform_4(%arg0: i32) -> (i32, i32) {
    %c0_i32 = arith.constant 0 : i32
    %c0_i32_0 = arith.constant 0 : i32
    %c0_i32_1 = arith.constant 0 : i32
    return %c0_i32, %c0_i32_0 : i32, i32
  }
  func.func @transform_5(%arg0: i32) -> (i32, i32) {
    %c0_i32 = arith.constant 0 : i32
    %c0_i32_0 = arith.constant 0 : i32
    %c0_i32_1 = arith.constant 0 : i32
    return %c0_i32, %c0_i32_0 : i32, i32
  }
  func.func @transform_6(%arg0: i32) -> (i32, i32) {
    %c0_i32 = arith.constant 0 : i32
    %c0_i32_0 = arith.constant 0 : i32
    %c0_i32_1 = arith.constant 0 : i32
    return %c0_i32, %c0_i32_0 : i32, i32
  }
  func.func @transform_7(%arg0: i32) -> (i32, i32, i32) {
    %c0_i32 = arith.constant 0 : i32
    %c0_i32_0 = arith.constant 0 : i32
    %c0_i32_1 = arith.constant 0 : i32
    return %arg0, %c0_i32, %c0_i32_0 : i32, i32, i32
  }
}

</mosaic_0001>

<bundles_post_ra>
// kernel: tpu_custom_call.1
= control target key start
LH: loop header
LB: loop body
LE: loop exit
PB: predicated region body
PF: predicated region fallthrough
CT: control target
= control target key end

     0   :  { %12 = vsyncpa [#allocation3], 0  ;;  %s929_s0 = inlined_call_operand.vmem [shape: f32[2,4,16], index: 0, kind: input, shape index: {}]   ;;  %s930_s1 = inlined_call_operand.vmem [shape: f32[8,8], index: 1, kind: input, shape index: {}]   ;;  %s931_s2 = inlined_call_operand.vmem [shape: f32[8,1], index: 2, kind: input, shape index: {}]   ;;  %s932_s3 = inlined_call_operand.vmem [shape: f32[8,16], index: 3, kind: input, shape index: {}]   ;;  %s933_s4 = inlined_call_operand.vmem [shape: f32[8,1], index: 4, kind: input, shape index: {}]   ;;  %s934_s5 = inlined_call_operand.vmem [shape: f32[8,4], index: 5, kind: input, shape index: {}]   ;;  %s935_s6 = inlined_call_operand.vmem [shape: f32[8,1], index: 6, kind: input, shape index: {}]   ;;  %s936_s7 = inlined_call_operand.hbm [shape: f32[2,8,16], index: 7, kind: output, shape index: {}]  }
   0x1   :  { %14 = vsyncpa [#allocation3 + $0x1], 0  ;;  %s814_s24 = smov 0   ;;  %s816_s25 = smov 0  }
   0x2   :  { %s818_s26 = smov 0   ;;  %s820_s27 = smov 0  }
   0x3 LB: > { %s835_s28 = sadd.s32 4294967295, %s766_s27   ;;  %s620_s29 = sadd.s32 4294967294, %s766_s27   ;;  %s766_s27 = sphi %s820_s27, %s942_s27   ;;  %s762_s26 = sphi %s818_s26, %s941_s26   ;;  %s758_s25 = sphi %s816_s25, %s940_s25   ;;  %s754_s24 = sphi %s814_s24, %s939_s24  }
   0x4   : > { %s839_s30 = sadd.s32 1, %s766_s27   ;;  %s179_s8 = sadd.s32 1, %s762_s26 }
   0x5   : > { %s176_s9 = ssub.s32 %s766_s27, %s839_s30  ;;  %p189_p0 = scmp.ne.s32.totalorder %s762_s26, %s758_s25 }
   0x6   : > { %p177_p1 = scmp.eq.s32.totalorder %s176_s9, 0  ;;  %p190_p2 = scmp.eq.s32.totalorder %s835_s28, 1 }
   0x7   : > { %p195_p3 = scmp.ne.s32.totalorder %s758_s25, %s754_s24  ;;  %p196_p4 = scmp.eq.s32.totalorder %s620_s29, 1 }
   0x8   : > { %s850_s10 = scalar_select %p177_p1, %s762_s26, %s179_s8  }
   0x9   : > { %p852_p5 = por %p190_p2, %p189_p0  ;;  %p856_p6 = por %p196_p4, %p195_p3 }
   0xa   : > { %p623_p7 = scmp.ge.s32.totalorder %s766_s27, 1  ;;  %p239_p8 = scmp.lt.s32.totalorder %s766_s27, 3 }
   0xc   : > { %p240_p9 = pnand %p623_p7, %p239_p8 }
   0xd   : > { %p270_p10 = scmp.lt.s32.totalorder (!%p240_p9), %s835_s28, 1  ;;  %s768_s18 = smov (!%p240_p9), 1  }
   0xe   : > { %243 = sbr.rel (%p240_p9) target bundleno = 904 (0x388), region = 48  ;;  %s772_s21 = smov (!%p240_p9), 127  }
   0xf   : > { %s633_s20 = sshll.u32 (!%p240_p9), %s835_s28, 7 }
  0x10   : > { %s559_s8 = scalar_lea.hbm (!%p240_p9), %s936_s7, %s633_s20 }
  0x13   : > { %s271_s13 = scalar_select %p270_p10, %s835_s28, 1  ;;  %v769_v1 = vmov 0.0   ;;  %vm770_vm0 = vmmov 0   ;;  %v289_v2 = vld [vmem:[%s931_s2] sm:$0xff]  ;;  %v771_v3 = vmov 0   ;;  %vm280_vm1 = vcmask 7168  }
  0x14   : > { %643 = vmatprep.subr.mxu0 %v769_v1  ;;  %648 = vmatprep.subr.mxu1 %v769_v1  ;;  %vm287_vm2 = vcmask 1043456   ;;  %v275_v8 = vld [vmem:[%s930_s1] sm:$0xff]  ;;  %vm295_vm3 = vcmask 64512   ;;  %vm468_vm4 = vcmask 31744   ;;  %vm627_vm5 = vmneg %vm280_vm1  ;;  %vm386_vm6 = vcmask 130048  }
  0x15   : > { %s625_s14 = sshll.u32 %s271_s13, 2  ;;  %645 = vmatprep.mubr.msk.f32.mxu0 %vm770_vm0, %v769_v1  ;;  %652 = vmatprep.mubr.msk.f32.mxu1 %vm770_vm0, %v769_v1  ;;  %v380_v15 = vld [vmem:[%s933_s4] sm:$0xff] }
  0x16   : > { %s273_s17 = scalar_lea.vmem %s929_s0, %s625_s14  ;;  %704 = vset.pattern.permute.xlu1 %v771_v3  ;;  %705 = vset.pattern.permute.xlu0 %v771_v3  ;;  %v461_v16 = vld [vmem:[%s934_s5] sm:$0xff]  ;;  %s773_s14 = smov [#allocation2]  }
  0x17   : > { %v274_v0 = vld [vmem:[%s273_s17] sm:$0xf]  ;;  %292 = vperm.xlu1 %704, %v289_v2   ;;  %s710_s15 = sshll.u32 %s773_s14, 4  ;;  %s711_s15 = int_to_ptr.vmem [resolvable:$false] %s710_s15 }
  0x18   : > { %277 = vrot.lane.b32.xlu0 %v274_v0, %s768_s18  ;;  %v462_v19 = vld [vmem:[%s935_s6] sm:$0xff]  ;;  %s712_s28 = scalar_lea.vmem %s711_s15, 256 }
  0x19   : > { %v370_v21 = vld [vmem:[%s932_s3] sm:$0xff] }
  0x8a   : > { %v278_v4 = vpop.permute.xlu0 %277 }
  0x8b   : > { %v281_v5 = vsel %vm280_vm1, 0.0, %v278_v4 }
  0x8c   : > { %v283_v6 = vrot.slane %v281_v5, 4 }
  0x8e   : > { %284 = vrot.lane.b32.xlu0 %v283_v6, %s772_s21 }
  0x92   : > { %v293_v10 = vpop.permute.xlu1 %292 }
 0x100   : > { %v285_v7 = vpop.permute.xlu0 %284 }
 0x101   : > { %v288_v9 = vsel %vm287_vm2, %v281_v5, %v285_v7 }
 0x102   : > { %644 = vmatpush3.msra.mxu0 %v288_v9 }
 0x103   : > { %646 = vmatmul.mubr.msk.f32.vlgmr.msra.gmra.mxu0 %vm295_vm3, %v275_v8  ;;  %655 = vmatprep.subr.mxu0 %v769_v1 }
 0x104   : > { %656 = vmatpush3.msk.msra.mxu0 %vm287_vm2, %v274_v0  ;;  %657 = vmatprep.mubr.msk.f32.mxu0 %vm770_vm0, %v769_v1 }
 0x107   : > { %658 = vmatmul.mubr.msk.f32.vlgmr.msra.gmra.mxu0 %vm468_vm4, %v461_v16 }
 0x1c3   : > { %v365_v11 = vpop.f32.mrf.mxu0 }
 0x1c4   : > { %v366_v12 = vadd.f32 %v365_v11, %v293_v10 }
 0x1c5   : > { %v647_v13 = vpop.f32.mrf.mxu0 }
 0x1c6   : > { %v369_v14 = vmax.f32 %v366_v12, 0.0 }
 0x1c7   : > { %v540_v22 = vpop.f32.mrf.mxu0 }
 0x1c8   : > { %372 = vrot.lane.b32.xlu1 %v369_v14, %s768_s18  ;;  %s267_s18 = sand.u32 1, %s758_s25  }
 0x1c9   : > { %v659_v23 = vpop.f32.mrf.mxu0  ;;  %s624_s19 = sshll.u32 %s267_s18, 3  ;;  %s548_s9 = scalar_lea.sflag [#allocation3], %s267_s18 }
 0x1cc   : > { %383 = vperm.xlu1 %704, %v380_v15  }
 0x23a   : > { %v373_v17 = vpop.permute.xlu1 %372 }
 0x23b   : > { %v375_v18 = vsel %vm280_vm1, 0.0, %v373_v17 }
 0x23c   : > { %377 = vrot.lane.b32.xlu0 %v375_v18, %s772_s21  ;;  %s269_s21 = scalar_lea.vmem [#allocation2], %s624_s19 }
 0x23d   : > { %s561_s22 = sshll.u32 %s269_s21, 4  ;;  %s562_s22 = int_to_ptr.vmem [resolvable:$true] %s561_s22 }
 0x23e   : > { %s706_s13 = scalar_lea.vmem %s562_s22, 128  ;;  %p713_p0 = scmp.lt.s32.totalorder %s562_s22, %s711_s15 }
 0x23f   : > { %p707_p11 = scmp.ne.s32.totalorder %s562_s22, %s706_s13  ;;  %p714_p1 = scmp.lt.s32.totalorder %s712_s28, %s706_s13 }
 0x240   : > { %465 = vperm.xlu0 %705, %v462_v19  }
 0x241   : > { %p708_p12 = pnand %p707_p11, %p852_p5  ;;  %p715_p2 = por %p714_p1, %p713_p0 }
 0x243   : > { %p709_p13 = pneg %p708_p12 }
 0x245   : > { %p716_p3 = pnand %p715_p2, %p709_p13 }
 0x247   : > { %v384_v25 = vpop.permute.xlu1 %383 }
 0x2ae   : > { %v378_v20 = vpop.permute.xlu0 %377 }
 0x2af   : > { %649 = vmatpush3.msra.mxu1 %v378_v20 }
 0x2b0   : > { %650 = vmatprep.subr.mxu1 %v769_v1 }
 0x2b1   : > { %651 = vmatpush3.msk.msra.mxu1 %vm627_vm5, %v373_v17 }
 0x2b2   : > { %653 = vmatmul.mubr.msk.f32.vlgmr.msra.gmra.mxu1 %vm386_vm6, %v370_v21 }
 0x2bb   : > { %v466_v24 = vpop.permute.xlu0 %465 }
 0x2bc   : > { %v541_v28 = vadd.f32 %v540_v22, %v466_v24 }
 0x372   : > { %v456_v26 = vpop.f32.mrf.mxu1 }
 0x373   : > { %v457_v27 = vadd.f32 %v456_v26, %v384_v25 }
 0x374   : > { %v654_v29 = vpop.f32.mrf.mxu1 }
 0x375   : > { %v460_v30 = vmax.f32 %v457_v27, 0.0 }
 0x377   : > { %v544_v31 = vadd.f32 %v541_v28, %v460_v30 }
 0x379   : > { %v545_v32 = vmax.f32 %v544_v31, 0.0 }
 0x37b   : > { %546 = vst.msk [vmem:[%s269_s21] sm:$0xff] %vm386_vm6, %v545_v32 }
 0x37c   : > { %719 = shalt.err (!%p716_p3)
}
 0x37d   : > { %s720_s16 = scalar_lea.hbm %s559_s8, 128  ;;  %s724_s19 = scalar_lea.hbm %s936_s7, 256 }
 0x37e   : > { %p721_p4 = scmp.ne.s32.totalorder %s559_s8, %s720_s16  ;;  %p725_p9 = scmp.lt.s32.totalorder %s559_s8, %s936_s7 }
 0x37f   : > { %p726_p10 = scmp.lt.s32.totalorder %s724_s19, %s720_s16 }
 0x380   : > { %p722_p7 = pnand %p721_p4, %p852_p5 }
 0x381   : > { %p727_p11 = por %p726_p10, %p725_p9 }
 0x382   : > { %p723_p8 = pneg %p722_p7 }
 0x384   : > { %p728_p12 = pnand %p727_p11, %p723_p8 }
 0x386   : > { %731 = shalt.err (!%p728_p12)
}
 0x387   : > { %660 = dma.vmem_to_hbm [thread:$0]  (%p852_p5), %s562_s22, 128, %s559_s8, %s548_s9  }
 0x388 PF: > { %p666_p13 = scmp.ge.s32.totalorder %s766_s27, 2  ;;  %s573_s23 = sand.u32 1, %s754_s24  }
 0x389   : > { %s574_s29 = scalar_lea.sflag [#allocation3], %s573_s23 }
 0x38a   : > { %p663_p0 = pnand %p666_p13, %p856_p6 }
 0x38c   : > { %p664_p1 = pneg %p663_p0 }
 0x38e   : > { %749 = dma.done.wait (%p664_p1), %s574_s29, 128  }
 0x38f   : > { %751 = vsyncadd (%p664_p1), %s574_s29, 4294967168  ;;  %p17_p2 = scmp.ge.s32.totalorder %s839_s30, 4   ;;  %s939_s24 = smov %s758_s25 }
 0x390   : > { %s940_s25 = smov %s762_s26  ;;  %s941_s26 = smov %s850_s10 }
 0x391   : > { %s942_s27 = smov %s839_s30  ;;  %19 = sbr.rel (!%p17_p2) target bundleno = 3 (0x3), region = 83 }
 0x396   :  { %579 = vsyncpa [#allocation3], 1 }
 0x397   :  { %581 = vsyncpa [#allocation3 + $0x1], 1 }

</bundles_post_ra>
